<compile_context>
chip_gen: v7x
topology: tpu7x:2x2x1
jax: 0.10.0
libtpu: 0.0.40
codegen_flags: <defaults>
</compile_context>

<pallas_src>
import functools

import jax
import jax.numpy as jnp
from jax.experimental import pallas as pl
from jax.experimental.pallas import tpu as pltpu

SUBLANE = 8  # sublane tile height for f32 vregs


def rnn_kernel(x_ref, wih_ref, whh_ref, b_ref, wfc_ref, bfc_ref,
               out_ref, p_ref, *, seq_len, batch_pad):
    """Whole sequence in one invocation.

    x_ref   : (T*Bp, I) bf16  time-major, batch-padded input (row = t*Bp + b)
    wih_ref : (I, H)    bf16  W_ih^T
    whh_ref : (H, H)    bf16  W_hh^T
    b_ref   : (1, H)    f32   b_ih + b_hh (pre-summed)
    wfc_ref : (H, O)    bf16  W_fc^T
    bfc_ref : (1, O)    f32
    out_ref : (Bp, O)   f32   sigmoid(fc(h_T))  (padded rows discarded outside)
    p_ref   : (T*Bp, H) f32   VMEM scratch: hoisted input projection
    """
    # ---- Prologue: one batched bf16 MXU matmul for every time step at once ----
    p_ref[...] = (jnp.dot(x_ref[...], wih_ref[...],
                          preferred_element_type=jnp.float32)
                  + b_ref[...])                               # (T*Bp, H) f32

    w_hh = whh_ref[...]                                       # bf16 (H, H), load once
    h = jnp.zeros((batch_pad, w_hh.shape[0]), jnp.float32)    # h0 = zeros, f32

    # ---- Recurrence: only the serial h @ W_hh^T + tanh chain per step -------
    # seq_len is static and small -> fully unrolled; slice starts are static
    # multiples of 8 (batch padded to a sublane tile) -> aligned vreg loads.
    for t in range(seq_len):
        p_t = p_ref[pl.ds(t * batch_pad, batch_pad), :]       # (Bp, H) f32, aligned
        h = jnp.tanh(p_t + jnp.dot(h.astype(jnp.bfloat16), w_hh,
                                   preferred_element_type=jnp.float32))

    # ---- Epilogue: final Linear + Sigmoid (VPU/EUP; off the MXU chain) ------
    logits = (jnp.dot(h.astype(jnp.bfloat16), wfc_ref[...],
                      preferred_element_type=jnp.float32)
              + bfc_ref[...])
    out_ref[...] = jax.nn.sigmoid(logits)


def rnn_model_forward(x, params):
    """x: (B, T, input_size) float32 -> (B, output_size) float32."""
    w_ih, w_hh, b_ih, b_hh, w_fc, b_fc = params
    B, T, I = x.shape
    H = w_hh.shape[0]
    O = w_fc.shape[0]
    B_pad = ((B + SUBLANE - 1) // SUBLANE) * SUBLANE          # pad batch to 8 rows

    # Wrapper-side layout plumbing only (no compute):
    #   time-major, batch-padded (zero rows b >= B), flattened, bf16 MXU inputs.
    x_tm = jnp.transpose(x, (1, 0, 2))                        # (T, B, I)
    x_tm = jnp.pad(x_tm, ((0, 0), (0, B_pad - B), (0, 0)))    # (T, Bp, I)
    x_flat = x_tm.reshape(T * B_pad, I).astype(jnp.bfloat16)  # row = t*Bp + b

    wih_t = w_ih.T.astype(jnp.bfloat16)                       # (I, H)
    whh_t = w_hh.T.astype(jnp.bfloat16)                       # (H, H)
    wfc_t = w_fc.T.astype(jnp.bfloat16)                       # (H, O)
    b_sum = (b_ih + b_hh).reshape(1, H).astype(jnp.float32)   # pre-summed bias
    bfc_2d = b_fc.reshape(1, O).astype(jnp.float32)

    kernel = functools.partial(rnn_kernel, seq_len=T, batch_pad=B_pad)

    grid_spec = pltpu.PrefetchScalarGridSpec(
        num_scalar_prefetch=0,
        grid=(1,),                                            # whole seq, one step
        in_specs=[
            pl.BlockSpec((T * B_pad, I), lambda i: (0, 0)),   # x (padded, flattened)
            pl.BlockSpec((I, H),         lambda i: (0, 0)),   # W_ih^T
            pl.BlockSpec((H, H),         lambda i: (0, 0)),   # W_hh^T
            pl.BlockSpec((1, H),         lambda i: (0, 0)),   # b_ih + b_hh
            pl.BlockSpec((H, O),         lambda i: (0, 0)),   # W_fc^T
            pl.BlockSpec((1, O),         lambda i: (0, 0)),   # b_fc
        ],
        out_specs=pl.BlockSpec((B_pad, O), lambda i: (0, 0)),
        scratch_shapes=[pltpu.VMEM((T * B_pad, H), jnp.float32)],  # projection slab
    )

    out_pad = pl.pallas_call(
        kernel,
        out_shape=jax.ShapeDtypeStruct((B_pad, O), jnp.float32),
        grid_spec=grid_spec,
        compiler_params=pltpu.CompilerParams(
            dimension_semantics=("arbitrary",),
            vmem_limit_bytes=32 * 1024 * 1024),
    )(x_flat, wih_t, whh_t, b_sum, wfc_t, bfc_2d)

    return out_pad[:B]                                        # drop padded rows


def rnn_model_reference(x, params):
    """Pure-JAX f32 reference matching torch.nn.RNN(batch_first=True) + Linear + Sigmoid."""
    w_ih, w_hh, b_ih, b_hh, w_fc, b_fc = params
    B = x.shape[0]
    H = w_hh.shape[0]
    h0 = jnp.zeros((B, H), jnp.float32)

    def step(h, x_t):
        h_new = jnp.tanh(x_t @ w_ih.T + b_ih + h @ w_hh.T + b_hh)
        return h_new, None

    h_last, _ = jax.lax.scan(step, h0, jnp.transpose(x, (1, 0, 2)))
    return jax.nn.sigmoid(h_last @ w_fc.T + b_fc)


if __name__ == "__main__":
    # Small shapes consistent with the module's forward pass.
    B, T = 2, 8
    input_size, hidden_size, output_size = 16, 32, 8

    key = jax.random.PRNGKey(0)
    kx, k1, k2, k3, k4, k5, k6 = jax.random.split(key, 7)

    x = jax.random.normal(kx, (B, T, input_size), jnp.float32)

    # Deterministic synthetic parameters (shapes from nn.RNN / nn.Linear).
    scale_rnn = 1.0 / jnp.sqrt(hidden_size)
    scale_fc = 1.0 / jnp.sqrt(hidden_size)
    params = (
        jax.random.uniform(k1, (hidden_size, input_size), jnp.float32,
                           -scale_rnn, scale_rnn),             # W_ih
        jax.random.uniform(k2, (hidden_size, hidden_size), jnp.float32,
                           -scale_rnn, scale_rnn),             # W_hh
        jax.random.uniform(k3, (hidden_size,), jnp.float32,
                           -scale_rnn, scale_rnn),             # b_ih
        jax.random.uniform(k4, (hidden_size,), jnp.float32,
                           -scale_rnn, scale_rnn),             # b_hh
        jax.random.uniform(k5, (output_size, hidden_size), jnp.float32,
                           -scale_fc, scale_fc),               # W_fc
        jax.random.uniform(k6, (output_size,), jnp.float32,
                           -scale_fc, scale_fc),               # b_fc
    )

    out = rnn_model_forward(x, params)
    out = jax.block_until_ready(out)

    ref = rnn_model_reference(x, params)
    assert out.shape == (B, output_size)
    # bf16 MXU inputs vs f32 reference -> loosen tolerance slightly.
    assert jnp.allclose(out, ref, atol=2e-2, rtol=2e-2), "mismatch vs reference"

    print("KERNEL_OK")
</pallas_src>

<mosaic_0001>
module attributes {stable_mosaic.version = 11 : i64} {
  func.func @rnn_kernel(%arg0: i32, %arg1: memref<64x16xbf16, #tpu.memory_space<vmem>>, %arg2: memref<16x32xbf16, #tpu.memory_space<vmem>>, %arg3: memref<32x32xbf16, #tpu.memory_space<vmem>>, %arg4: memref<1x32xf32, #tpu.memory_space<vmem>>, %arg5: memref<32x8xbf16, #tpu.memory_space<vmem>>, %arg6: memref<1x8xf32, #tpu.memory_space<vmem>>, %arg7: memref<8x8xf32, #tpu.memory_space<vmem>>, %arg8: memref<64x32xf32, #tpu.memory_space<vmem>>) attributes {dimension_semantics = [#tpu.dimension_semantics<arbitrary>], iteration_bounds = array<i64: 1>, scalar_prefetch = 0 : i64, scratch_operands = 1 : i64, tpu.core_type = #tpu.core_type<tc>, window_params = [{pipeline_mode = #tpu.pipeline_mode<synchronous>, transform_indices = @transform_0, window_bounds = array<i64: 64, 16>}, {pipeline_mode = #tpu.pipeline_mode<synchronous>, transform_indices = @transform_1, window_bounds = array<i64: 16, 32>}, {pipeline_mode = #tpu.pipeline_mode<synchronous>, transform_indices = @transform_2, window_bounds = array<i64: 32, 32>}, {pipeline_mode = #tpu.pipeline_mode<synchronous>, transform_indices = @transform_3, window_bounds = array<i64: 1, 32>}, {pipeline_mode = #tpu.pipeline_mode<synchronous>, transform_indices = @transform_4, window_bounds = array<i64: 32, 8>}, {pipeline_mode = #tpu.pipeline_mode<synchronous>, transform_indices = @transform_5, window_bounds = array<i64: 1, 8>}, {pipeline_mode = #tpu.pipeline_mode<synchronous>, transform_indices = @transform_6, window_bounds = array<i64: 8, 8>}]} {
    %c0 = arith.constant 0 : index
    %c0_0 = arith.constant 0 : index
    %0 = vector.load %arg1[%c0, %c0_0] : memref<64x16xbf16, #tpu.memory_space<vmem>>, vector<64x16xbf16>
    %c0_1 = arith.constant 0 : index
    %c0_2 = arith.constant 0 : index
    %1 = vector.load %arg2[%c0_1, %c0_2] : memref<16x32xbf16, #tpu.memory_space<vmem>>, vector<16x32xbf16>
    %cst = arith.constant dense<0.000000e+00> : vector<64x32xf32>
    %2 = tpu.matmul %0, %1, %cst {dimension_numbers = #tpu.dot_dimension_numbers<[1], [0], [0], [1], [0, 0, 1, 1], [], []>} : vector<64x16xbf16>, vector<16x32xbf16>, vector<64x32xf32> -> vector<64x32xf32>
    %c0_3 = arith.constant 0 : index
    %c0_4 = arith.constant 0 : index
    %3 = vector.load %arg4[%c0_3, %c0_4] : memref<1x32xf32, #tpu.memory_space<vmem>>, vector<1x32xf32>
    %4 = vector.broadcast %3 : vector<1x32xf32> to vector<64x32xf32>
    %5 = arith.addf %2, %4 : vector<64x32xf32>
    %c0_5 = arith.constant 0 : index
    %c0_6 = arith.constant 0 : index
    %6 = vector.load %arg8[%c0_5, %c0_6] : memref<64x32xf32, #tpu.memory_space<vmem>>, vector<64x32xf32>
    tpu.vector_store %arg8[%c0_5, %c0_6], %5 {strides = array<i32>} : memref<64x32xf32, #tpu.memory_space<vmem>>, vector<64x32xf32>,
    %c0_7 = arith.constant 0 : index
    %c0_8 = arith.constant 0 : index
    %7 = vector.load %arg3[%c0_7, %c0_8] : memref<32x32xbf16, #tpu.memory_space<vmem>>, vector<32x32xbf16>
    %cst_9 = arith.constant 0.000000e+00 : f32
    %8 = vector.broadcast %cst_9 : f32 to vector<8x32xf32>
    %c0_10 = arith.constant 0 : index
    %c0_11 = arith.constant 0 : index
    %9 = vector.load %arg8[%c0_10, %c0_11] : memref<64x32xf32, #tpu.memory_space<vmem>>, vector<8x32xf32>
    %10 = arith.truncf %8 : vector<8x32xf32> to vector<8x32xbf16>
    %cst_12 = arith.constant dense<0.000000e+00> : vector<8x32xf32>
    %11 = tpu.matmul %10, %7, %cst_12 {dimension_numbers = #tpu.dot_dimension_numbers<[1], [0], [0], [1], [0, 0, 1, 1], [], []>} : vector<8x32xbf16>, vector<32x32xbf16>, vector<8x32xf32> -> vector<8x32xf32>
    %12 = arith.addf %9, %11 : vector<8x32xf32>
    %13 = math.tanh %12 : vector<8x32xf32>
    %c8 = arith.constant 8 : index
    %c0_13 = arith.constant 0 : index
    %14 = vector.load %arg8[%c8, %c0_13] : memref<64x32xf32, #tpu.memory_space<vmem>>, vector<8x32xf32>
    %15 = arith.truncf %13 : vector<8x32xf32> to vector<8x32xbf16>
    %cst_14 = arith.constant dense<0.000000e+00> : vector<8x32xf32>
    %16 = tpu.matmul %15, %7, %cst_14 {dimension_numbers = #tpu.dot_dimension_numbers<[1], [0], [0], [1], [0, 0, 1, 1], [], []>} : vector<8x32xbf16>, vector<32x32xbf16>, vector<8x32xf32> -> vector<8x32xf32>
    %17 = arith.addf %14, %16 : vector<8x32xf32>
    %18 = math.tanh %17 : vector<8x32xf32>
    %c16 = arith.constant 16 : index
    %c0_15 = arith.constant 0 : index
    %19 = vector.load %arg8[%c16, %c0_15] : memref<64x32xf32, #tpu.memory_space<vmem>>, vector<8x32xf32>
    %20 = arith.truncf %18 : vector<8x32xf32> to vector<8x32xbf16>
    %cst_16 = arith.constant dense<0.000000e+00> : vector<8x32xf32>
    %21 = tpu.matmul %20, %7, %cst_16 {dimension_numbers = #tpu.dot_dimension_numbers<[1], [0], [0], [1], [0, 0, 1, 1], [], []>} : vector<8x32xbf16>, vector<32x32xbf16>, vector<8x32xf32> -> vector<8x32xf32>
    %22 = arith.addf %19, %21 : vector<8x32xf32>
    %23 = math.tanh %22 : vector<8x32xf32>
    %c24 = arith.constant 24 : index
    %c0_17 = arith.constant 0 : index
    %24 = vector.load %arg8[%c24, %c0_17] : memref<64x32xf32, #tpu.memory_space<vmem>>, vector<8x32xf32>
    %25 = arith.truncf %23 : vector<8x32xf32> to vector<8x32xbf16>
    %cst_18 = arith.constant dense<0.000000e+00> : vector<8x32xf32>
    %26 = tpu.matmul %25, %7, %cst_18 {dimension_numbers = #tpu.dot_dimension_numbers<[1], [0], [0], [1], [0, 0, 1, 1], [], []>} : vector<8x32xbf16>, vector<32x32xbf16>, vector<8x32xf32> -> vector<8x32xf32>
    %27 = arith.addf %24, %26 : vector<8x32xf32>
    %28 = math.tanh %27 : vector<8x32xf32>
    %c32 = arith.constant 32 : index
    %c0_19 = arith.constant 0 : index
    %29 = vector.load %arg8[%c32, %c0_19] : memref<64x32xf32, #tpu.memory_space<vmem>>, vector<8x32xf32>
    %30 = arith.truncf %28 : vector<8x32xf32> to vector<8x32xbf16>
    %cst_20 = arith.constant dense<0.000000e+00> : vector<8x32xf32>
    %31 = tpu.matmul %30, %7, %cst_20 {dimension_numbers = #tpu.dot_dimension_numbers<[1], [0], [0], [1], [0, 0, 1, 1], [], []>} : vector<8x32xbf16>, vector<32x32xbf16>, vector<8x32xf32> -> vector<8x32xf32>
    %32 = arith.addf %29, %31 : vector<8x32xf32>
    %33 = math.tanh %32 : vector<8x32xf32>
    %c40 = arith.constant 40 : index
    %c0_21 = arith.constant 0 : index
    %34 = vector.load %arg8[%c40, %c0_21] : memref<64x32xf32, #tpu.memory_space<vmem>>, vector<8x32xf32>
    %35 = arith.truncf %33 : vector<8x32xf32> to vector<8x32xbf16>
    %cst_22 = arith.constant dense<0.000000e+00> : vector<8x32xf32>
    %36 = tpu.matmul %35, %7, %cst_22 {dimension_numbers = #tpu.dot_dimension_numbers<[1], [0], [0], [1], [0, 0, 1, 1], [], []>} : vector<8x32xbf16>, vector<32x32xbf16>, vector<8x32xf32> -> vector<8x32xf32>
    %37 = arith.addf %34, %36 : vector<8x32xf32>
    %38 = math.tanh %37 : vector<8x32xf32>
    %c48 = arith.constant 48 : index
    %c0_23 = arith.constant 0 : index
    %39 = vector.load %arg8[%c48, %c0_23] : memref<64x32xf32, #tpu.memory_space<vmem>>, vector<8x32xf32>
    %40 = arith.truncf %38 : vector<8x32xf32> to vector<8x32xbf16>
    %cst_24 = arith.constant dense<0.000000e+00> : vector<8x32xf32>
    %41 = tpu.matmul %40, %7, %cst_24 {dimension_numbers = #tpu.dot_dimension_numbers<[1], [0], [0], [1], [0, 0, 1, 1], [], []>} : vector<8x32xbf16>, vector<32x32xbf16>, vector<8x32xf32> -> vector<8x32xf32>
    %42 = arith.addf %39, %41 : vector<8x32xf32>
    %43 = math.tanh %42 : vector<8x32xf32>
    %c56 = arith.constant 56 : index
    %c0_25 = arith.constant 0 : index
    %44 = vector.load %arg8[%c56, %c0_25] : memref<64x32xf32, #tpu.memory_space<vmem>>, vector<8x32xf32>
    %45 = arith.truncf %43 : vector<8x32xf32> to vector<8x32xbf16>
    %cst_26 = arith.constant dense<0.000000e+00> : vector<8x32xf32>
    %46 = tpu.matmul %45, %7, %cst_26 {dimension_numbers = #tpu.dot_dimension_numbers<[1], [0], [0], [1], [0, 0, 1, 1], [], []>} : vector<8x32xbf16>, vector<32x32xbf16>, vector<8x32xf32> -> vector<8x32xf32>
    %47 = arith.addf %44, %46 : vector<8x32xf32>
    %48 = math.tanh %47 : vector<8x32xf32>
    %49 = arith.truncf %48 : vector<8x32xf32> to vector<8x32xbf16>
    %c0_27 = arith.constant 0 : index
    %c0_28 = arith.constant 0 : index
    %50 = vector.load %arg5[%c0_27, %c0_28] : memref<32x8xbf16, #tpu.memory_space<vmem>>, vector<32x8xbf16>
    %cst_29 = arith.constant dense<0.000000e+00> : vector<8x8xf32>
    %51 = tpu.matmul %49, %50, %cst_29 {dimension_numbers = #tpu.dot_dimension_numbers<[1], [0], [0], [1], [0, 0, 1, 1], [], []>} : vector<8x32xbf16>, vector<32x8xbf16>, vector<8x8xf32> -> vector<8x8xf32>
    %c0_30 = arith.constant 0 : index
    %c0_31 = arith.constant 0 : index
    %52 = vector.load %arg6[%c0_30, %c0_31] : memref<1x8xf32, #tpu.memory_space<vmem>>, vector<1x8xf32>
    %53 = vector.broadcast %52 : vector<1x8xf32> to vector<8x8xf32>
    %54 = arith.addf %51, %53 : vector<8x8xf32>
    %55 = arith.negf %54 : vector<8x8xf32>
    %56 = math.exp %55 : vector<8x8xf32>
    %cst_32 = arith.constant 1.000000e+00 : f32
    %57 = vector.broadcast %cst_32 : f32 to vector<8x8xf32>
    %58 = arith.addf %57, %56 : vector<8x8xf32>
    %59 = arith.divf %57, %58 : vector<8x8xf32>
    %c0_33 = arith.constant 0 : index
    %c0_34 = arith.constant 0 : index
    %60 = vector.load %arg7[%c0_33, %c0_34] : memref<8x8xf32, #tpu.memory_space<vmem>>, vector<8x8xf32>
    tpu.vector_store %arg7[%c0_33, %c0_34], %59 {strides = array<i32>} : memref<8x8xf32, #tpu.memory_space<vmem>>, vector<8x8xf32>,
    return
  }
  func.func @transform_0(%arg0: i32) -> (i32, i32) {
    %c0_i32 = arith.constant 0 : i32
    %c0_i32_0 = arith.constant 0 : i32
    %c0_i32_1 = arith.constant 0 : i32
    return %c0_i32, %c0_i32_0 : i32, i32
  }
  func.func @transform_1(%arg0: i32) -> (i32, i32) {
    %c0_i32 = arith.constant 0 : i32
    %c0_i32_0 = arith.constant 0 : i32
    %c0_i32_1 = arith.constant 0 : i32
    return %c0_i32, %c0_i32_0 : i32, i32
  }
  func.func @transform_2(%arg0: i32) -> (i32, i32) {
    %c0_i32 = arith.constant 0 : i32
    %c0_i32_0 = arith.constant 0 : i32
    %c0_i32_1 = arith.constant 0 : i32
    return %c0_i32, %c0_i32_0 : i32, i32
  }
  func.func @transform_3(%arg0: i32) -> (i32, i32) {
    %c0_i32 = arith.constant 0 : i32
    %c0_i32_0 = arith.constant 0 : i32
    %c0_i32_1 = arith.constant 0 : i32
    return %c0_i32, %c0_i32_0 : i32, i32
  }
  func.func @transform_4(%arg0: i32) -> (i32, i32) {
    %c0_i32 = arith.constant 0 : i32
    %c0_i32_0 = arith.constant 0 : i32
    %c0_i32_1 = arith.constant 0 : i32
    return %c0_i32, %c0_i32_0 : i32, i32
  }
  func.func @transform_5(%arg0: i32) -> (i32, i32) {
    %c0_i32 = arith.constant 0 : i32
    %c0_i32_0 = arith.constant 0 : i32
    %c0_i32_1 = arith.constant 0 : i32
    return %c0_i32, %c0_i32_0 : i32, i32
  }
  func.func @transform_6(%arg0: i32) -> (i32, i32) {
    %c0_i32 = arith.constant 0 : i32
    %c0_i32_0 = arith.constant 0 : i32
    %c0_i32_1 = arith.constant 0 : i32
    return %c0_i32, %c0_i32_0 : i32, i32
  }
}

</mosaic_0001>

<bundles_post_ra>
// kernel: tpu_custom_call.1
= control target key start
LH: loop header
LB: loop body
LE: loop exit
PB: predicated region body
PF: predicated region fallthrough
CT: control target
= control target key end

     0   :  { %vm68_vm0 = vcmask 130048   ;;  %v830_v3 = vmov 0.0   ;;  %vm831_vm1 = vmmov 0   ;;  %s990_s0 = inlined_call_operand.vmem [shape: bf16[64,16], index: 0, kind: input, shape index: {}]   ;;  %s991_s1 = inlined_call_operand.vmem [shape: bf16[16,32], index: 1, kind: input, shape index: {}]   ;;  %s992_s2 = inlined_call_operand.vmem [shape: bf16[32,32], index: 2, kind: input, shape index: {}]   ;;  %s993_s3 = inlined_call_operand.vmem [shape: f32[1,32], index: 3, kind: input, shape index: {}]   ;;  %s994_s4 = inlined_call_operand.vmem [shape: bf16[32,8], index: 4, kind: input, shape index: {}]   ;;  %s995_s5 = inlined_call_operand.vmem [shape: f32[1,8], index: 5, kind: input, shape index: {}]   ;;  %s996_s6 = inlined_call_operand.hbm [shape: f32[8,8], index: 6, kind: output, shape index: {}]  }
   0x1   :  { %v777_v0 = vld [vmem:[%s991_s1] sm:$0xff]   ;;  %v779_v2 = vld [vmem:[%s990_s0 + $0x8] sm:$0xff]   ;;  %701 = vmatprep.subr.bf16.mxu1 %v830_v3  ;;  %705 = vmatprep.mubr.msk.bf16.mxu1 %vm831_vm1, %v830_v3 }
   0x2   :  { %v778_v1 = vld [vmem:[%s990_s0] sm:$0xff]   ;;  %691 = vmatprep.subr.bf16.mxu0 %v777_v0  ;;  %v888_v5 = vld [vmem:[%s992_s2 + $0x8] sm:$0xff]  }
   0x3   :  { %692 = vmatpush3.bf16.msra.mxu0 %v777_v0  ;;  %693 = vmatprep.mubr.msk.bf16.mxu0 %vm68_vm0, %v778_v1  ;;  %v883_v4 = vld [vmem:[%s992_s2] sm:$0xff]  }
   0x4   :  { %717 = vmatprep.subr.bf16.mxu0 %v830_v3  ;;  %702 = vmatpush3.bf16.msra.mxu1 %v883_v4 }
   0x5   :  { %703 = vmatprep.subr.bf16.mxu1 %v830_v3 }
   0x6   :  { %694 = vmatmul.mubr.msk.bf16.vlgmr.msra.gmra.mrb[0].mxu0 %vm68_vm0, %v779_v2 }
   0x7   :  { %718 = vmatpush3.bf16.msra.mxu0 %v883_v4 }
   0x8   :  { %11 = vsyncpa [#allocation4], 0  ;;  %719 = vmatprep.subr.bf16.mxu0 %v830_v3  ;;  %704 = vmatpush3.bf16.msra.mxu1 %v888_v5  ;;  %v832_v6 = vmov 0   ;;  %v635_v7 = vld [vmem:[%s993_s3] ss:$0 sm:$0xff]  ;;  %vm146_vm2 = vcmask 261120  }
   0x9   :  { %709 = vmatprep.subr.bf16.mxu1 %v830_v3  ;;  %v782_v24 = vld [vmem:[%s990_s0 + $0x10] sm:$0xff]   ;;  %v783_v25 = vld [vmem:[%s990_s0 + $0x18] sm:$0xff]   ;;  %vm619_vm3 = vcmask 64512  }
   0xa   :  { %697 = vmatprep.mubr.msk.bf16.mxu0 %vm68_vm0, %v782_v24 }
   0xb   :  { %720 = vmatpush3.bf16.msra.mxu0 %v888_v5  ;;  %706 = vmatmul.mubr.bf16.vlgmr.msra.gmra.mrb[0].mxu1 %v832_v6 }
   0xc   :  { %733 = vmatprep.subr.bf16.mxu0 %v830_v3  ;;  %710 = vmatpush3.bf16.msra.mxu1 %v883_v4 }
   0xd   :  { %713 = vmatprep.mubr.msk.bf16.mxu1 %vm831_vm1, %v830_v3  ;;  %711 = vmatprep.subr.bf16.mxu1 %v830_v3 }
   0xe   :  { %698 = vmatmul.mubr.msk.bf16.gmra.mrb[4].mxu0 %vm68_vm0, %v783_v25 }
   0xf   :  { %721 = vmatprep.mubr.msk.bf16.mxu0 %vm831_vm1, %v830_v3 }
  0x10   :  { %712 = vmatpush3.bf16.msra.mxu1 %v888_v5 }
  0x11   :  { %725 = vmatprep.subr.bf16.mxu1 %v830_v3 }
  0xd9   :  { %v695_v8 = vpop.f32.mrb[0].mxu0 }
  0xda   :  { %v124_v9 = vadd.f32 %v695_v8, %v635_v7  ;;  %v115_v10 = vpop.f32.mrb[1].mxu0 }
  0xdb   :  { %v116_v11 = vadd.f32 %v635_v7, %v115_v10  ;;  %v696_v12 = vpop.f32.mrb[2].mxu0 }
  0xdc   :  { %149 = vst.msk [vmem:[#allocation2 + $0x10] sm:$0xff] %vm146_vm2, %v124_v9  ;;  %v127_v13 = vadd.f32 %v696_v12, %v635_v7  ;;  %v118_v14 = vpop.f32.mrb[3].mxu0 }
  0xdd   :  { %147 = vst.msk [vmem:[#allocation2] sm:$0xff] %vm146_vm2, %v116_v11  ;;  %v119_v15 = vadd.f32 %v635_v7, %v118_v14 }
  0xde   :  { %150 = vst.msk [vmem:[#allocation2 + $0x18] sm:$0xff] %vm146_vm2, %v127_v13  ;;  %v209_v16 = vpop.f32.mrb[0].mxu1 }
  0xdf   :  { %148 = vst.msk [vmem:[#allocation2 + $0x8] sm:$0xff] %vm146_vm2, %v119_v15  ;;  %v707_v17 = vpop.f32.mrb[1].mxu1 }
  0xe0   :  { %v212_v18 = vpop.f32.mrb[2].mxu1 }
  0xe1   :  { %v708_v19 = vpop.f32.mrb[3].mxu1  ;;  %v699_v34 = vpop.f32.mrb[4].mxu0 }
  0xe2   :  { %v140_v35 = vadd.f32 %v699_v34, %v635_v7  ;;  %v131_v36 = vpop.f32.mrb[5].mxu0  ;;  %v784_v19 = vld [vmem:[%s994_s4] sm:$0xff]  }
  0xe3   :  { %v132_v37 = vadd.f32 %v635_v7, %v131_v36  ;;  %v700_v38 = vpop.f32.mrb[6].mxu0  ;;  %v264_v42 = vld [vmem:[#allocation2 + $0x10] sm:$0xff] }
  0xe4   :  { %v159_v20 = vld [vmem:[#allocation2] sm:$0xff]  ;;  %153 = vst.msk [vmem:[#allocation2 + $0x30] sm:$0xff] %vm146_vm2, %v140_v35  ;;  %v143_v39 = vadd.f32 %v700_v38, %v635_v7  ;;  %v134_v40 = vpop.f32.mrb[7].mxu0 }
  0xe5   :  { %v215_v21 = vadd.f32 %v209_v16, %v159_v20  ;;  %151 = vst.msk [vmem:[#allocation2 + $0x20] sm:$0xff] %vm146_vm2, %v132_v37  ;;  %v135_v41 = vadd.f32 %v635_v7, %v134_v40  ;;  %v311_v50 = vld [vmem:[#allocation2 + $0x18] sm:$0xff]  ;;  %v785_v20 = vld [vmem:[%s994_s4 + $0x8] sm:$0xff]   ;;  %s833_s4 = smov [#allocation3]  }
  0xe6   :  { %v217_v26 = vld [vmem:[#allocation2 + $0x8] sm:$0xff]  ;;  %154 = vst.msk [vmem:[#allocation2 + $0x38] sm:$0xff] %vm146_vm2, %v143_v39  ;;  %s627_s15 = sshll.u32 %s833_s4, 4  ;;  %s628_s15 = int_to_ptr.vmem [resolvable:$true] %s627_s15 }
  0xe7   :  { %786 = vtanh.f32 %v215_v21  ;;  %152 = vst.msk [vmem:[#allocation2 + $0x28] sm:$0xff] %vm146_vm2, %v135_v41  ;;  %s806_s16 = scalar_lea.vmem %s628_s15, 128  ;;  %p811_p1 = scmp.lt.s32.totalorder %s628_s15, %s628_s15 }
  0xe8   :  { %p807_p0 = scmp.ne.s32.totalorder %s628_s15, %s806_s16  ;;  %p812_p2 = scmp.lt.s32.totalorder %s806_s16, %s806_s16 }
  0xea   :  { %p813_p3 = por %p812_p2, %p811_p1 }
  0xec   :  { %v358_v58 = vld [vmem:[#allocation2 + $0x20] sm:$0xff]  ;;  %p814_p4 = pnand %p813_p3, %p807_p0 }
  0xed   :  { %v499_v21 = vld [vmem:[#allocation2 + $0x38] sm:$0xff] }
  0xee   :  { %v405_v2 = vld [vmem:[#allocation2 + $0x28] sm:$0xff] }
  0xf1   :  { %v787_v22 = vpop.eup %786 }
  0xf2   :  { %v218_v23 = vpack.c.bf16 %v787_v22, %v787_v22 }
  0xf4   :  { %714 = vmatmul.mubr.msk.bf16.vlgmr.msra.gmra.mrb[4].mxu1 %vm146_vm2, %v218_v23 }
  0xf5   :  { %726 = vmatpush3.bf16.msra.mxu1 %v883_v4  ;;  %729 = vmatprep.mubr.msk.bf16.mxu1 %vm831_vm1, %v830_v3 }
  0xf6   :  { %727 = vmatprep.subr.bf16.mxu1 %v830_v3 }
  0xf9   :  { %728 = vmatpush3.bf16.msra.mxu1 %v888_v5 }
  0xfa   :  { %741 = vmatprep.subr.bf16.mxu1 %v830_v3 }
 0x1c7   :  { %v256_v27 = vpop.f32.mrb[4].mxu1 }
 0x1c8   :  { %v262_v28 = vadd.f32 %v256_v27, %v217_v26  ;;  %v715_v29 = vpop.f32.mrb[5].mxu1 }
 0x1c9   :  { %v259_v30 = vpop.f32.mrb[6].mxu1 }
 0x1ca   :  { %788 = vtanh.f32 %v262_v28  ;;  %v716_v31 = vpop.f32.mrb[7].mxu1 }
 0x1d4   :  { %v789_v32 = vpop.eup %788 }
 0x1d5   :  { %v265_v33 = vpack.c.bf16 %v789_v32, %v789_v32 }
 0x1d7   :  { %722 = vmatmul.mubr.msk.bf16.vlgmr.msra.gmra.mrb[8].mxu0 %vm146_vm2, %v265_v33 }
 0x1d8   :  { %734 = vmatpush3.bf16.msra.mxu0 %v883_v4  ;;  %737 = vmatprep.mubr.msk.bf16.mxu0 %vm831_vm1, %v830_v3 }
 0x1d9   :  { %735 = vmatprep.subr.bf16.mxu0 %v830_v3 }
 0x1dc   :  { %736 = vmatpush3.bf16.msra.mxu0 %v888_v5 }
 0x1dd   :  { %749 = vmatprep.subr.bf16.mxu0 %v830_v3 }
 0x2aa   :  { %v303_v43 = vpop.f32.mrb[8].mxu0 }
 0x2ab   :  { %v309_v44 = vadd.f32 %v303_v43, %v264_v42  ;;  %v723_v45 = vpop.f32.mrb[9].mxu0 }
 0x2ac   :  { %v306_v46 = vpop.f32.mrb[10].mxu0 }
 0x2ad   :  { %790 = vtanh.f32 %v309_v44  ;;  %v724_v47 = vpop.f32.mrb[11].mxu0 }
 0x2b7   :  { %v791_v48 = vpop.eup %790 }
 0x2b8   :  { %v312_v49 = vpack.c.bf16 %v791_v48, %v791_v48 }
 0x2ba   :  { %730 = vmatmul.mubr.msk.bf16.vlgmr.msra.gmra.mrb[8].mxu1 %vm146_vm2, %v312_v49 }
 0x2bb   :  { %742 = vmatpush3.bf16.msra.mxu1 %v883_v4  ;;  %745 = vmatprep.mubr.msk.bf16.mxu1 %vm831_vm1, %v830_v3 }
 0x2bc   :  { %743 = vmatprep.subr.bf16.mxu1 %v830_v3 }
 0x2bf   :  { %744 = vmatpush3.bf16.msra.mxu1 %v888_v5 }
 0x2c0   :  { %757 = vmatprep.subr.bf16.mxu1 %v830_v3 }
 0x38d   :  { %v350_v51 = vpop.f32.mrb[8].mxu1 }
 0x38e   :  { %v356_v52 = vadd.f32 %v350_v51, %v311_v50  ;;  %v731_v53 = vpop.f32.mrb[9].mxu1 }
 0x38f   :  { %v353_v54 = vpop.f32.mrb[10].mxu1 }
 0x390   :  { %792 = vtanh.f32 %v356_v52  ;;  %v732_v55 = vpop.f32.mrb[11].mxu1 }
 0x39a   :  { %v793_v56 = vpop.eup %792 }
 0x39b   :  { %v359_v57 = vpack.c.bf16 %v793_v56, %v793_v56 }
 0x39d   :  { %738 = vmatmul.mubr.msk.bf16.vlgmr.msra.gmra.mrb[12].mxu0 %vm146_vm2, %v359_v57 }
 0x39e   :  { %750 = vmatpush3.bf16.msra.mxu0 %v883_v4  ;;  %753 = vmatprep.mubr.msk.bf16.mxu0 %vm831_vm1, %v830_v3 }
 0x39f   :  { %751 = vmatprep.subr.bf16.mxu0 %v830_v3 }
 0x3a2   :  { %752 = vmatpush3.bf16.msra.mxu0 %v888_v5 }
 0x3a3   :  { %765 = vmatprep.subr.bf16.mxu0 %v830_v3 }
 0x470   :  { %v397_v59 = vpop.f32.mrb[12].mxu0 }
 0x471   :  { %v403_v60 = vadd.f32 %v397_v59, %v358_v58  ;;  %v739_v61 = vpop.f32.mrb[13].mxu0 }
 0x472   :  { %v400_v62 = vpop.f32.mrb[14].mxu0 }
 0x473   :  { %794 = vtanh.f32 %v403_v60  ;;  %v740_v63 = vpop.f32.mrb[15].mxu0 }
 0x47d   :  { %v795_v0 = vpop.eup %794 }
 0x47e   :  { %v406_v1 = vpack.c.bf16 %v795_v0, %v795_v0 }
 0x480   :  { %746 = vmatmul.mubr.msk.bf16.vlgmr.msra.gmra.mrb[12].mxu1 %vm146_vm2, %v406_v1 }
 0x481   :  { %758 = vmatpush3.bf16.msra.mxu1 %v883_v4  ;;  %761 = vmatprep.mubr.msk.bf16.mxu1 %vm831_vm1, %v830_v3  ;;  %v452_v4 = vld [vmem:[#allocation2 + $0x30] sm:$0xff] }
 0x482   :  { %759 = vmatprep.subr.bf16.mxu1 %v830_v3 }
 0x485   :  { %760 = vmatpush3.bf16.msra.mxu1 %v888_v5 }
 0x553   :  { %v444_v6 = vpop.f32.mrb[12].mxu1 }
 0x554   :  { %v450_v7 = vadd.f32 %v444_v6, %v405_v2  ;;  %v747_v8 = vpop.f32.mrb[13].mxu1 }
 0x555   :  { %v447_v9 = vpop.f32.mrb[14].mxu1 }
 0x556   :  { %796 = vtanh.f32 %v450_v7  ;;  %v748_v10 = vpop.f32.mrb[15].mxu1 }
 0x560   :  { %v797_v11 = vpop.eup %796 }
 0x561   :  { %v453_v12 = vpack.c.bf16 %v797_v11, %v797_v11 }
 0x563   :  { %754 = vmatmul.mubr.msk.bf16.vlgmr.msra.gmra.mrb[16].mxu0 %vm146_vm2, %v453_v12 }
 0x564   :  { %769 = vmatprep.mubr.msk.bf16.mxu0 %vm831_vm1, %v830_v3  ;;  %766 = vmatpush3.bf16.msra.mxu0 %v784_v19 }
 0x565   :  { %767 = vmatprep.subr.bf16.mxu0 %v830_v3  ;;  %v654_v3 = vld [vmem:[%s995_s5] ss:$0 sm:$0xff] }
 0x568   :  { %768 = vmatpush3.bf16.msra.mxu0 %v785_v20 }
 0x636   :  { %v491_v13 = vpop.f32.mrb[16].mxu0 }
 0x637   :  { %v497_v14 = vadd.f32 %v491_v13, %v452_v4  ;;  %v755_v15 = vpop.f32.mrb[17].mxu0 }
 0x638   :  { %v494_v16 = vpop.f32.mrb[18].mxu0 }
 0x639   :  { %798 = vtanh.f32 %v497_v14  ;;  %v756_v5 = vpop.f32.mrb[19].mxu0 }
 0x643   :  { %v799_v17 = vpop.eup %798 }
 0x644   :  { %v500_v18 = vpack.c.bf16 %v799_v17, %v799_v17 }
 0x646   :  { %762 = vmatmul.mubr.msk.bf16.vlgmr.msra.gmra.mrb[16].mxu1 %vm146_vm2, %v500_v18 }
 0x719   :  { %v538_v22 = vpop.f32.mrb[16].mxu1 }
 0x71a   :  { %v544_v23 = vadd.f32 %v538_v22, %v499_v21  ;;  %v763_v24 = vpop.f32.mrb[17].mxu1 }
 0x71b   :  { %v541_v25 = vpop.f32.mrb[18].mxu1 }
 0x71c   :  { %800 = vtanh.f32 %v544_v23  ;;  %v764_v26 = vpop.f32.mrb[19].mxu1 }
 0x726   :  { %v801_v27 = vpop.eup %800 }
 0x727   :  { %v546_v28 = vpack.c.bf16 %v801_v27, %v801_v27 }
 0x729   :  { %770 = vmatmul.mubr.msk.bf16.vlgmr.msra.gmra.mrb[20].mxu0 %vm146_vm2, %v546_v28 }
 0x7fc   :  { %v607_v29 = vpop.f32.mrb[20].mxu0 }
 0x7fd   :  { %v608_v30 = vadd.f32 %v654_v3, %v607_v29  ;;  %v771_v31 = vpop.f32.mrb[21].mxu0 }
 0x7fe   :  { %v610_v32 = vpop.f32.mrb[22].mxu0 }
 0x7ff   :  { %v658_v33 = vmul.f32 -1.442695, %v608_v30  ;;  %v772_v34 = vpop.f32.mrb[23].mxu0 }
 0x801   :  { %802 = vpow2.f32 %v658_v33 }
 0x80b   :  { %v803_v35 = vpop.eup %802 }
 0x80c   :  { %v616_v36 = vadd.f32 1.0, %v803_v35 }
 0x80e   :  { %804 = vrcp.f32 %v616_v36 }
 0x818   :  { %v805_v37 = vpop.eup %804 }
 0x819   :  { %620 = vst.msk [vmem:[#allocation3] sm:$0xff] %vm619_vm3, %v805_v37 }
 0x81a   :  { %817 = shalt.err (!%p814_p4)
}
 0x81b   :  { %s818_s18 = scalar_lea.hbm %s996_s6, 128 }
 0x81c   :  { %p819_p5 = scmp.ne.s32.totalorder %s996_s6, %s818_s18  ;;  %p822_p6 = scmp.lt.u32.totalorder %s818_s18, %s996_s6 }
 0x81e   :  { %p824_p7 = pnand %p822_p6, %p819_p5 }
 0x820   :  { %827 = shalt.err (!%p824_p7)
}
 0x821   :  { %630 = dma.vmem_to_hbm [thread:$0]  %s628_s15, 128, %s996_s6, [#allocation4]  }
 0x822   :  { %828 = dma.done.wait [#allocation4], 128  }
 0x823   :  { %829 = vsyncadd [#allocation4], 4294967168 }
 0x824   :  { %634 = vsyncpa [#allocation4], 1 }

</bundles_post_ra>
